<compile_context>
chip_gen: v6e
topology: v6e:2x2x1
jax: 0.10.0
libtpu: 0.0.40
codegen_flags: <defaults>
</compile_context>

<pallas_src>
import functools
import math

import jax
import jax.numpy as jnp
from jax import lax
from jax.experimental import pallas as pl
from jax.experimental.pallas import tpu as pltpu

EPS = 1e-6                                    # LayerNormalization eps
DROPOUT_P = 0.1                               # ResidualConnection dropout prob (train)
_DROP_THRESHOLD = int(DROPOUT_P * (1 << 32))  # uint32 threshold: bits < thr -> drop
_SCALE = 1.0 / (1.0 - DROPOUT_P)              # inverted-dropout scale
_GOLDEN = 0x9E3779B9

# pl.reciprocal(approx=True) only lowers on the Mosaic/TPU path; gate it so the same
# script also runs under CPU / interpret-mode checking.
_ON_TPU = jax.default_backend() == "tpu"


# ---------------- tile selection helpers ----------------

def _pick_tm(n_rows: int, d: int, itemsize: int = 4,
             target_bytes: int = 4 * 1024 * 1024) -> int:
    """Token-tile rows for elementwise kernels: multiple of 8, ~4 MiB per (tm, d)
    buffer. Big enough to amortize the ~0.35 us/grid-step overhead on v6e, small
    enough that double-buffered inputs + output stay well inside v7x's 64 MiB VMEM."""
    if n_rows < 8:
        return n_rows
    tm = target_bytes // max(1, d * itemsize)
    tm = max(8, min(tm, 1024, n_rows))
    return int((tm // 8) * 8)


def _pick_matmul_tiles(n_rows: int, d_out: int):
    """(tm, tn) for the fused matmul. Weight HBM traffic = (N/tm)*K*d_out, so tm is
    pushed to 256-512 when enough rows exist; tn is a 128-multiple divisor of d_out
    (lane-dense stores, amortizes the 256-wide MXU weight push on v6e/v7x)."""
    if n_rows < 8:
        tm = n_rows
    else:
        tm = min(512, max(8, (min(n_rows, 512) // 8) * 8))
    if d_out % 256 == 0:
        tn = 256
    elif d_out % 128 == 0:
        tn = 128
    else:
        tn = d_out                 # small / odd widths: single full-width column tile
    return tm, tn


def _fused_vmem_bytes(tm: int, k: int, tn: int, in_isz: int, op_isz: int) -> int:
    dbuf = 2                                            # BlockSpec double-buffering
    return (dbuf * tm * k * in_isz                      # x full-K row tiles (LN input)
            + dbuf * k * tn * in_isz                    # W column tiles
            + dbuf * tn * in_isz                        # linear bias tiles
            + dbuf * tm * tn * in_isz * 2               # residual x + output tiles
            + tm * k * op_isz)                          # normed scratch


def _vmem_limit(est_bytes: int):
    """Only bump the scoped VMEM limit when the footprint exceeds the v5e 16 MiB
    default; cap below v7x's 64 MiB physical VMEM to leave pipelining headroom."""
    if est_bytes <= 16 * 1024 * 1024:
        return None
    return int(min(max(est_bytes * 5 // 4, 32 * 1024 * 1024), 56 * 1024 * 1024))


# ---------------- in-kernel math helpers ----------------

def _uniform_bits(shape, row0_u32, col0_u32, ncols_u32, seed_u32):
    """Counter-based uint32 hash (murmur-style finalizer) of the GLOBAL element index
    (row, col within the full d_out width). Mask is therefore identical regardless of
    tiling, so the fused and unfused paths agree bit-for-bit. Plain VPU integer ops
    only -> lowers on Mosaic and in interpret mode.
    TODO(synk): on hardware-only builds switch to pltpu.prng_seed/prng_random_bits to
    take the ~10 int-op hash off the VALU path (no interpret lowering today)."""
    rows = lax.broadcasted_iota(jnp.int32, shape, 0).astype(jnp.uint32) + row0_u32
    cols = lax.broadcasted_iota(jnp.int32, shape, 1).astype(jnp.uint32) + col0_u32
    x = (rows * ncols_u32 + cols) ^ (seed_u32 * jnp.uint32(_GOLDEN))
    x = x ^ (x >> 16)
    x = x * jnp.uint32(0x7FEB352D)
    x = x ^ (x >> 15)
    x = x * jnp.uint32(0x846CA68B)
    x = x ^ (x >> 16)
    return x


def _layer_norm_tile(x_f32, alpha, bias):
    """alpha*(x-mean)/(std+eps)+bias, torch-style unbiased std (N-1), stats in f32.
    NOTE: matches the custom LayerNormalization module (x.std() + eps), not
    torch.nn.LayerNorm."""
    d = x_f32.shape[-1]
    mean = jnp.mean(x_f32, axis=-1, keepdims=True)
    diff = x_f32 - mean
    var = jnp.sum(diff * diff, axis=-1, keepdims=True) * (1.0 / (d - 1))
    std = jnp.sqrt(var)
    if _ON_TPU:
        inv = alpha * pl.reciprocal(std + EPS, approx=True)   # EUP slot, ~free
    else:
        inv = alpha / (std + EPS)
    return diff * inv + bias


# ---------------- Pallas kernels ----------------

def _layernorm_kernel(alpha_ref, bias_ref, x_ref, o_ref):
    x = x_ref[...].astype(jnp.float32)
    o_ref[...] = _layer_norm_tile(x, alpha_ref[0], bias_ref[0]).astype(o_ref.dtype)


def _residual_dropout_kernel(seed_ref, x_ref, y_ref, o_ref):
    """out = x + dropout(y); integer-threshold dropout, arithmetic in native dtype."""
    tm, d = x_ref.shape
    row0 = (pl.program_id(0) * tm).astype(jnp.uint32)
    bits = _uniform_bits((tm, d), row0, jnp.uint32(0), jnp.uint32(d),
                         seed_ref[0].astype(jnp.uint32))
    keep = bits >= jnp.uint32(_DROP_THRESHOLD)          # P(keep) = 1 - DROPOUT_P
    y = y_ref[...]
    dropped = jnp.where(keep, y * jnp.asarray(_SCALE, y.dtype), jnp.zeros_like(y))
    o_ref[...] = (x_ref[...] + dropped.astype(x_ref.dtype)).astype(o_ref.dtype)


def _fused_ln_linear_residual_dropout_kernel(
        seed_ref, alpha_ref, bias_ref, xk_ref, w_ref, b_ref, xr_ref, o_ref,
        xn_ref, *, d_out):
    """LayerNorm + (normed @ W + b) + dropout + residual, one kernel, no HBM
    round-trip for the normalized activations or the sublayer output.

    Grid = (token tiles i [parallel], output-column tiles j [arbitrary]); K (= D) is
    unsplit, so there is no K loop and no f32 accumulator scratch."""
    # IMPORTANT: every pl.program_id call must stay at the kernel top level -- calling
    # it inside a pl.when body has no lowering inside the nested cond (this was the
    # previous interpret-mode compile failure).
    i = pl.program_id(0)
    j = pl.program_id(1)
    tm, tn = o_ref.shape
    row0 = (i * tm).astype(jnp.uint32)
    col0 = (j * tn).astype(jnp.uint32)
    alpha = alpha_ref[0]
    bias = bias_ref[0]

    # Normalize the resident (tm, K) token tile once per token tile (j == 0); keep it
    # in VMEM scratch in the MXU operand dtype and reuse for every output column tile.
    @pl.when(j == 0)
    def _():
        xf = xk_ref[...].astype(jnp.float32)
        xn_ref[...] = _layer_norm_tile(xf, alpha, bias).astype(xn_ref.dtype)

    y = jnp.dot(xn_ref[...], w_ref[...], preferred_element_type=jnp.float32)
    y = y + b_ref[...].astype(jnp.float32)

    bits = _uniform_bits((tm, tn), row0, col0, jnp.uint32(d_out),
                         seed_ref[0].astype(jnp.uint32))
    keep = bits >= jnp.uint32(_DROP_THRESHOLD)
    dropped = jnp.where(keep, y * jnp.float32(_SCALE), jnp.zeros_like(y))
    o_ref[...] = (xr_ref[...].astype(jnp.float32) + dropped).astype(o_ref.dtype)


# ---------------- Wrappers ----------------

def layer_norm(x2d, alpha, bias):
    n, d = x2d.shape
    tm = _pick_tm(n, d, x2d.dtype.itemsize)
    return pl.pallas_call(
        _layernorm_kernel,
        out_shape=jax.ShapeDtypeStruct((n, d), x2d.dtype),
        grid=(pl.cdiv(n, tm),),
        in_specs=[
            pl.BlockSpec(memory_space=pltpu.SMEM),        # alpha (1,)
            pl.BlockSpec(memory_space=pltpu.SMEM),        # bias  (1,)
            pl.BlockSpec((tm, d), lambda i: (i, 0)),      # x tile
        ],
        out_specs=pl.BlockSpec((tm, d), lambda i: (i, 0)),
        compiler_params=pltpu.CompilerParams(dimension_semantics=("parallel",)),
    )(alpha, bias, x2d)


def residual_dropout(x2d, y2d, seed, *, donate_x=False):
    n, d = x2d.shape
    tm = _pick_tm(n, d, x2d.dtype.itemsize)
    return pl.pallas_call(
        _residual_dropout_kernel,
        out_shape=jax.ShapeDtypeStruct((n, d), x2d.dtype),
        grid=(pl.cdiv(n, tm),),
        in_specs=[
            pl.BlockSpec(memory_space=pltpu.SMEM),        # seed (1,) int32
            pl.BlockSpec((tm, d), lambda i: (i, 0)),      # x tile
            pl.BlockSpec((tm, d), lambda i: (i, 0)),      # y tile
        ],
        out_specs=pl.BlockSpec((tm, d), lambda i: (i, 0)),
        # Alias x -> out (skips a second NxD HBM buffer) only when the caller donates x.
        input_output_aliases={1: 0} if donate_x else {},
        compiler_params=pltpu.CompilerParams(dimension_semantics=("parallel",)),
    )(seed, x2d, y2d)


def residual_connection(x, sublayer, alpha, bias, seed):
    """Generic path (matches the PyTorch API: sublayer is an arbitrary callable)."""
    b, s, d = x.shape
    x2d = x.reshape(b * s, d)
    normed = layer_norm(x2d, alpha, bias)
    y = sublayer(normed.reshape(b, s, d))
    assert y.shape[-1] == d, "residual add requires sublayer output dim == D"
    return residual_dropout(x2d, y.reshape(b * s, d), seed).reshape(b, s, d)


def fused_linear_residual_connection(x, w, b_lin, alpha, bias, seed):
    """Fused path for a known linear sublayer: LayerNorm + matmul + dropout + residual
    all live in one kernel (no HBM round-trips for `normed` or the sublayer output)."""
    bsz, s, d = x.shape
    k_dim, d_out = w.shape
    assert k_dim == d and d_out == d, "residual add requires sublayer(in=D) -> out=D"
    n = bsz * s
    x2d = x.reshape(n, d)
    b2d = b_lin.reshape(1, d_out)

    tm, tn = _pick_matmul_tiles(n, d_out)
    # MXU operand dtype follows the input: pass bf16 activations/weights in production
    # for full v6e/v7x MXU rate and half the weight HBM bytes (accumulation stays f32).
    mxu_dtype = x2d.dtype
    vmem_limit = _vmem_limit(
        _fused_vmem_bytes(tm, d, tn, x2d.dtype.itemsize, jnp.dtype(mxu_dtype).itemsize))

    kernel = functools.partial(_fused_ln_linear_residual_dropout_kernel, d_out=d_out)

    out2d = pl.pallas_call(
        kernel,
        out_shape=jax.ShapeDtypeStruct((n, d_out), x2d.dtype),
        grid=(pl.cdiv(n, tm), d_out // tn),
        in_specs=[
            pl.BlockSpec(memory_space=pltpu.SMEM),            # seed  (1,)
            pl.BlockSpec(memory_space=pltpu.SMEM),            # alpha (1,)
            pl.BlockSpec(memory_space=pltpu.SMEM),            # bias  (1,)
            pl.BlockSpec((tm, d), lambda i, j: (i, 0)),       # x full-K row tile (LN in)
            pl.BlockSpec((d, tn), lambda i, j: (0, j)),       # W column tile
            pl.BlockSpec((1, tn), lambda i, j: (0, j)),       # linear bias tile
            pl.BlockSpec((tm, tn), lambda i, j: (i, j)),      # x residual tile
        ],
        out_specs=pl.BlockSpec((tm, tn), lambda i, j: (i, j)),
        scratch_shapes=[pltpu.VMEM((tm, d), mxu_dtype)],      # normed x, reused over j
        compiler_params=pltpu.CompilerParams(
            dimension_semantics=("parallel", "arbitrary"),
            vmem_limit_bytes=vmem_limit),
    )(seed, alpha, bias, x2d, w.astype(mxu_dtype), b2d.astype(x2d.dtype), x2d)
    return out2d.reshape(bsz, s, d_out)


# ---------------- Demo ----------------

if __name__ == "__main__":
    key = jax.random.PRNGKey(0)
    k_x, k_w, k_b = jax.random.split(key, 3)

    B, S, D = 2, 8, 32  # batch, seq, hidden
    x = jax.random.normal(k_x, (B, S, D), dtype=jnp.float32)

    # LayerNormalization params (scalar alpha=1, bias=0 as in __init__)
    alpha = jnp.ones((1,), dtype=jnp.float32)
    bias = jnp.zeros((1,), dtype=jnp.float32)

    # A simple deterministic linear sublayer.
    w = jax.random.normal(k_w, (D, D), dtype=jnp.float32) / math.sqrt(D)
    b_lin = jax.random.normal(k_b, (D,), dtype=jnp.float32) * 0.01
    seed = jnp.array([0], dtype=jnp.int32)

    # Generic path (arbitrary sublayer callable, sublayer runs as plain JAX).
    sublayer = lambda h: jnp.einsum("bsd,de->bse", h, w) + b_lin
    out = residual_connection(x, sublayer, alpha, bias, seed)

    # Fused path (known linear sublayer) — same hash-based dropout mask, so results agree.
    out_fused = fused_linear_residual_connection(x, w, b_lin, alpha, bias, seed)

    jax.block_until_ready((out, out_fused))
    assert out.shape == (B, S, D) and out.dtype == jnp.float32
    assert bool(jnp.allclose(out, out_fused, rtol=1e-3, atol=1e-3))
    print("KERNEL_OK")
</pallas_src>

<mosaic_0001>
module attributes {stable_mosaic.version = 11 : i64} {
  func.func @_layernorm_kernel(%arg0: i32, %arg1: memref<1xf32, #tpu.memory_space<smem>>, %arg2: memref<1xf32, #tpu.memory_space<smem>>, %arg3: memref<16x32xf32, #tpu.memory_space<vmem>>, %arg4: memref<16x32xf32, #tpu.memory_space<vmem>>) attributes {dimension_semantics = [#tpu.dimension_semantics<parallel>], iteration_bounds = array<i64: 1>, scalar_prefetch = 0 : i64, scratch_operands = 0 : i64, tpu.core_type = #tpu.core_type<tc>, window_params = [{transform_indices = @transform_0, window_bounds = array<i64: 1>}, {transform_indices = @transform_1, window_bounds = array<i64: 1>}, {transform_indices = @transform_2, window_bounds = array<i64: 16, 32>}, {transform_indices = @transform_3, window_bounds = array<i64: 16, 32>}]} {
    %c0 = arith.constant 0 : index
    %c0_0 = arith.constant 0 : index
    %0 = vector.load %arg3[%c0, %c0_0] : memref<16x32xf32, #tpu.memory_space<vmem>>, vector<16x32xf32>
    %c0_1 = arith.constant 0 : index
    %1 = memref.load %arg1[%c0_1] : memref<1xf32, #tpu.memory_space<smem>>
    %c0_2 = arith.constant 0 : index
    %2 = memref.load %arg2[%c0_2] : memref<1xf32, #tpu.memory_space<smem>>
    %cst = arith.constant dense<0.000000e+00> : vector<16xf32>
    %3 = vector.multi_reduction <add>, %0, %cst [1] : vector<16x32xf32> to vector<16xf32>
    %4 = vector.shape_cast %3 : vector<16xf32> to vector<16x1xf32>
    %cst_3 = arith.constant 3.200000e+01 : f32
    %5 = vector.broadcast %cst_3 : f32 to vector<16x1xf32>
    %6 = arith.divf %4, %5 : vector<16x1xf32>
    %7 = vector.broadcast %6 : vector<16x1xf32> to vector<16x32xf32>
    %8 = arith.subf %0, %7 : vector<16x32xf32>
    %9 = arith.mulf %8, %8 : vector<16x32xf32>
    %cst_4 = arith.constant dense<0.000000e+00> : vector<16xf32>
    %10 = vector.multi_reduction <add>, %9, %cst_4 [1] : vector<16x32xf32> to vector<16xf32>
    %11 = vector.shape_cast %10 : vector<16xf32> to vector<16x1xf32>
    %cst_5 = arith.constant 0.0322580636 : f32
    %12 = vector.broadcast %cst_5 : f32 to vector<16x1xf32>
    %13 = arith.mulf %11, %12 : vector<16x1xf32>
    %14 = math.sqrt %13 : vector<16x1xf32>
    %cst_6 = arith.constant 9.99999997E-7 : f32
    %15 = vector.broadcast %cst_6 : f32 to vector<16x1xf32>
    %16 = arith.addf %14, %15 : vector<16x1xf32>
    %17 = vector.broadcast %1 : f32 to vector<16x1xf32>
    %18 = arith.divf %17, %16 : vector<16x1xf32>
    %19 = vector.broadcast %18 : vector<16x1xf32> to vector<16x32xf32>
    %20 = arith.mulf %8, %19 : vector<16x32xf32>
    %21 = vector.broadcast %2 : f32 to vector<16x32xf32>
    %22 = arith.addf %20, %21 : vector<16x32xf32>
    %c0_7 = arith.constant 0 : index
    %c0_8 = arith.constant 0 : index
    %23 = vector.load %arg4[%c0_7, %c0_8] : memref<16x32xf32, #tpu.memory_space<vmem>>, vector<16x32xf32>
    tpu.vector_store %arg4[%c0_7, %c0_8], %22 {strides = array<i32>} : memref<16x32xf32, #tpu.memory_space<vmem>>, vector<16x32xf32>,
    return
  }
  func.func @transform_0(%arg0: i32) -> i32 {
    %c0_i32 = arith.constant 0 : i32
    %c0_i32_0 = arith.constant 0 : i32
    return %c0_i32 : i32
  }
  func.func @transform_1(%arg0: i32) -> i32 {
    %c0_i32 = arith.constant 0 : i32
    %c0_i32_0 = arith.constant 0 : i32
    return %c0_i32 : i32
  }
  func.func @transform_2(%arg0: i32) -> (i32, i32) {
    %c0_i32 = arith.constant 0 : i32
    %c0_i32_0 = arith.constant 0 : i32
    return %arg0, %c0_i32 : i32, i32
  }
  func.func @transform_3(%arg0: i32) -> (i32, i32) {
    %c0_i32 = arith.constant 0 : i32
    %c0_i32_0 = arith.constant 0 : i32
    return %arg0, %c0_i32 : i32, i32
  }
}

</mosaic_0001>

<bundles_post_ra>
// kernel: tpu_custom_call.1
= control target key start
LH: loop header
LB: loop body
LE: loop exit
PB: predicated region body
PF: predicated region fallthrough
CT: control target
= control target key end

     0   :  { %10 = vsyncpa [#allocation5], 0  ;;  %s206_s0 = inlined_call_operand.<no memory space> [shape: f32[1], index: 0, kind: input, shape index: {}]   ;;  %s207_s1 = inlined_call_operand.<no memory space> [shape: f32[1], index: 1, kind: input, shape index: {}]   ;;  %s208_s2 = inlined_call_operand.hbm [shape: f32[16,32], index: 2, kind: input, shape index: {}]   ;;  %s209_s3 = inlined_call_operand.hbm [shape: f32[16,32], index: 3, kind: output, shape index: {}]  }
   0x1   :  { %11 = vsyncpa [#allocation6], 0  ;;  %s158_s12 = smov [#allocation4]  }
   0x2   :  { %s21_s13 = sshll.u32 %s158_s12, 4  ;;  %s22_s13 = int_to_ptr.vmem [resolvable:$true] %s21_s13 }
   0x3   :  { %s122_s14 = scalar_lea.vmem %s22_s13, 256  ;;  %p127_p1 = scmp.lt.s32.totalorder %s22_s13, %s22_s13 }
   0x4   :  { %p123_p0 = scmp.ne.s32.totalorder %s22_s13, %s122_s14  ;;  %p128_p2 = scmp.lt.s32.totalorder %s122_s14, %s122_s14 }
   0x6   :  { %p129_p3 = por %p128_p2, %p127_p1 }
   0x8   :  { %p130_p4 = pnand %p129_p3, %p123_p0 }
   0xa   :  { %133 = shalt.err (!%p130_p4)
}
   0xb   :  { %s159_s15 = smov 128   ;;  %s160_s16 = smov 8  }
   0xc   :  { %27 = dma.hbm_to_vmem [thread:$0]  %s208_s2, 256, %s22_s13, [#allocation5], %s159_s15, %s159_s15, %s160_s16  }
   0xd   :  { %154 = dma.done.wait [#allocation5], 256  }
   0xe   :  { %155 = vsyncadd [#allocation5], 4294967040  ;;  %vm35_vm0 = vcmask 261120   ;;  %v31_v0 = vld [vmem:[#allocation4] sm:$0xff]  ;;  %v32_v1 = vld [vmem:[#allocation4 + $0x8] sm:$0xff]  ;;  %v73_v30 = vstv %s206_s0  ;;  %v80_v33 = vstv %s207_s1  ;;  %s161_s22 = smov [#allocation7]  }
   0xf   :  { %v36_v2 = vsel %vm35_vm0, %v31_v0, 0.0  ;;  %v39_v3 = vsel %vm35_vm0, %v32_v1, 0.0  ;;  %s90_s23 = sshll.u32 %s161_s22, 4  ;;  %s91_s23 = int_to_ptr.vmem [resolvable:$true] %s90_s23 }
  0x10   :  { %37 = vadd.xlane.f32.xlu0 %v36_v2  ;;  %s134_s0 = scalar_lea.vmem %s91_s23, 256  ;;  %p139_p6 = scmp.lt.s32.totalorder %s91_s23, %s91_s23 }
  0x11   :  { %p135_p5 = scmp.ne.s32.totalorder %s91_s23, %s134_s0  ;;  %p140_p7 = scmp.lt.s32.totalorder %s134_s0, %s134_s0 }
  0x13   :  { %p141_p8 = por %p140_p7, %p139_p6 }
  0x14   :  { %40 = vadd.xlane.f32.xlu0 %v39_v3 }
  0x15   :  { %p142_p9 = pnand %p141_p8, %p135_p5 }
  0x99   :  { %v38_v4 = vpop.xlane.xlu0 %37 }
  0x9a   :  { %v43_v5 = vmul.f32 0.03125, %v38_v4 }
  0x9c   :  { %v45_v6 = vsub.f32 %v31_v0, %v43_v5 }
  0x9d   :  { %v41_v7 = vpop.xlane.xlu0 %40 }
  0x9e   :  { %v44_v8 = vmul.f32 0.03125, %v41_v7  ;;  %v47_v9 = vmul.f32 %v45_v6, %v45_v6 }
  0xa0   :  { %v46_v10 = vsub.f32 %v32_v1, %v44_v8  ;;  %v49_v11 = vsel %vm35_vm0, %v47_v9, 0.0 }
  0xa1   :  { %50 = vadd.xlane.f32.xlu1 %v49_v11 }
  0xa2   :  { %v48_v12 = vmul.f32 %v46_v10, %v46_v10 }
  0xa4   :  { %v52_v13 = vsel %vm35_vm0, %v48_v12, 0.0 }
  0xa5   :  { %53 = vadd.xlane.f32.xlu1 %v52_v13 }
 0x12a   :  { %v51_v14 = vpop.xlane.xlu1 %50 }
 0x12b   :  { %v55_v15 = vmul.f32 0.032258064, %v51_v14 }
 0x12d   :  { %106 = vrsqrt.f32 %v55_v15  ;;  %vm59_vm1 = vcmp.eq.f32.partialorder %v55_v15, inf  ;;  %v62_v20 = vand.u32 2147483648, %v55_v15  ;;  %vm61_vm2 = vcmp.eq.f32.partialorder %v55_v15, 0.0 }
 0x12e   :  { %v54_v16 = vpop.xlane.xlu1 %53 }
 0x12f   :  { %v56_v17 = vmul.f32 0.032258064, %v54_v16 }
 0x131   :  { %108 = vrsqrt.f32 %v56_v17  ;;  %vm66_vm3 = vcmp.eq.f32.partialorder %v56_v17, inf  ;;  %v69_v26 = vand.u32 2147483648, %v56_v17  ;;  %vm68_vm4 = vcmp.eq.f32.partialorder %v56_v17, 0.0 }
 0x13a   :  { %v107_v18 = vpop.eup %106 }
 0x13b   :  { %v58_v19 = vmul.f32 %v107_v18, %v55_v15 }
 0x13d   :  { %v60_v21 = vsel %vm59_vm1, %v55_v15, %v58_v19 }
 0x13e   :  { %v109_v22 = vpop.eup %108  ;;  %v63_v23 = vsel %vm61_vm2, %v62_v20, %v60_v21 }
 0x13f   :  { %v71_v24 = vadd.f32 1e-06, %v63_v23  ;;  %v65_v25 = vmul.f32 %v109_v22, %v56_v17 }
 0x141   :  { %110 = vrcp.f32 %v71_v24  ;;  %v67_v27 = vsel %vm66_vm3, %v56_v17, %v65_v25 }
 0x142   :  { %v70_v28 = vsel %vm68_vm4, %v69_v26, %v67_v27 }
 0x143   :  { %v72_v29 = vadd.f32 1e-06, %v70_v28 }
 0x145   :  { %112 = vrcp.f32 %v72_v29 }
 0x14e   :  { %v111_v31 = vpop.eup %110 }
 0x14f   :  { %v75_v32 = vmul.f32 %v111_v31, %v73_v30 }
 0x151   :  { %v78_v34 = vmul.f32 %v75_v32, %v45_v6 }
 0x152   :  { %v113_v35 = vpop.eup %112 }
 0x153   :  { %v77_v36 = vmul.f32 %v113_v35, %v73_v30  ;;  %v81_v37 = vadd.f32 %v80_v33, %v78_v34 }
 0x155   :  { %v79_v38 = vmul.f32 %v77_v36, %v46_v10  ;;  %83 = vst.msk [vmem:[#allocation7] sm:$0xff] %vm35_vm0, %v81_v37 }
 0x157   :  { %v82_v39 = vadd.f32 %v80_v33, %v79_v38 }
 0x159   :  { %84 = vst.msk [vmem:[#allocation7 + $0x8] sm:$0xff] %vm35_vm0, %v82_v39 }
 0x15a   :  { %145 = shalt.err (!%p142_p9)
}
 0x15b   :  { %96 = dma.vmem_to_hbm [thread:$0]  %s91_s23, 256, %s209_s3, [#allocation6], %s159_s15, %s159_s15, %s160_s16  }
 0x15c   :  { %156 = dma.done.wait [#allocation6], 256  }
 0x15d   :  { %157 = vsyncadd [#allocation6], 4294967040 }
 0x15e   :  { %100 = vsyncpa [#allocation5], 1 }
 0x15f   :  { %101 = vsyncpa [#allocation6], 1 }

</bundles_post_ra>
